<compile_context>
chip_gen: v7x
topology: tpu7x:2x2x1
jax: 0.10.0
libtpu: 0.0.40
codegen_flags: <defaults>
</compile_context>

<pallas_src>
import jax
import jax.numpy as jnp
from jax.experimental import pallas as pl
from jax.experimental.pallas import tpu as pltpu

KGE_SIZE = 14
NOISE_SIZE = KGE_SIZE            # input dim = NOISE_SIZE + KGE_SIZE = 28
IN_DIM = NOISE_SIZE + KGE_SIZE   # 28
PATTERN_NUM = 32
PATTERN_LENGTH = 24              # module default pattern_length
LN_EPS = 1e-5


def _round_up(n, m):
    return ((n + m - 1) // m) * m


def _layernorm_1pass(h, gamma, beta):
    """LayerNorm over the last axis with single-pass statistics."""
    mu = jnp.mean(h, axis=-1, keepdims=True)
    mu2 = jnp.mean(h * h, axis=-1, keepdims=True)
    var = jnp.maximum(mu2 - mu * mu, 0.0)
    return (h - mu) * jax.lax.rsqrt(var + LN_EPS) * gamma + beta


def generator_kernel(x_ref, w1_ref, b1_ref, g1_ref, be1_ref,
                     pat_ref, g2_ref, be2_ref, o_ref):
    x = x_ref[...].astype(jnp.float32)

    # Linear(28 -> 32)
    h = jnp.dot(x, w1_ref[...], preferred_element_type=jnp.float32) + b1_ref[...]

    # LayerNorm(pattern_num)
    h = _layernorm_1pass(h, g1_ref[...], be1_ref[...])

    # Softmax over dim=1 (feature axis).  approx reciprocal: uniform per-row
    # scale error is removed by the following LayerNorm.
    m = jnp.max(h, axis=-1, keepdims=True)
    e = jnp.exp(h - m)
    p = e * pl.reciprocal(jnp.sum(e, axis=-1, keepdims=True), approx=True)

    # (BM, 32) @ (32, 24)
    r = jnp.dot(p, pat_ref[...], preferred_element_type=jnp.float32)

    # LayerNorm(pattern_length)
    r = _layernorm_1pass(r, g2_ref[...], be2_ref[...])

    # exact (erf) GELU — PyTorch nn.GELU default
    out = 0.5 * r * (1.0 + jax.lax.erf(r * (1.0 / jnp.sqrt(2.0))))
    o_ref[...] = out.astype(o_ref.dtype)


def generator_p_hd_sum(x, params, *, block_rows=1024):
    """x: (B, 28) float32 -> (B, 24) float32."""
    B = x.shape[0]

    # Row tile: multiple of 8, capped at `block_rows`; pad batch so every grid
    # step sees a full tile (padded rows are finite garbage, sliced off below).
    bm = min(block_rows, _round_up(max(B, 1), 8))
    b_pad = _round_up(B, bm)
    if b_pad != B:
        x = jnp.pad(x, ((0, b_pad - B), (0, 0)))
    grid = (b_pad // bm,)

    w1 = params["w1"]            # (28, 32)  (transposed PyTorch weight)
    b1 = params["b1"]            # (1, 32)
    g1, be1 = params["ln1_g"], params["ln1_b"]               # (1, 32)
    pat = params["patterns"]     # (32, 24)
    g2, be2 = params["ln2_g"], params["ln2_b"]               # (1, 24)

    def const_spec(shape):
        return pl.BlockSpec(shape, lambda i: tuple(0 for _ in shape))

    out = pl.pallas_call(
        generator_kernel,
        out_shape=jax.ShapeDtypeStruct((b_pad, PATTERN_LENGTH), jnp.float32),
        grid=grid,
        in_specs=[
            pl.BlockSpec((bm, IN_DIM), lambda i: (i, 0)),
            const_spec(w1.shape),
            const_spec(b1.shape),
            const_spec(g1.shape),
            const_spec(be1.shape),
            const_spec(pat.shape),
            const_spec(g2.shape),
            const_spec(be2.shape),
        ],
        out_specs=pl.BlockSpec((bm, PATTERN_LENGTH), lambda i: (i, 0)),
        compiler_params=pltpu.CompilerParams(
            dimension_semantics=("parallel",),
            vmem_limit_bytes=32 * 1024 * 1024,
        ),
    )(x, w1, b1, g1, be1, pat, g2, be2)

    return out[:B]


# ----------------------------- reference & init -----------------------------

def _orthogonal(key, rows, cols):
    """Deterministic orthogonal init (QR), matching nn.init.orthogonal_ intent."""
    a = jax.random.normal(key, (max(rows, cols), min(rows, cols)), jnp.float32)
    q, _ = jnp.linalg.qr(a)
    q = q[:max(rows, cols), :min(rows, cols)]
    if rows < cols:
        q = q.T
    return q[:rows, :cols]


def make_params(key):
    k1, k2, k3 = jax.random.split(key, 3)
    # PyTorch Linear weight is (out, in); kernel consumes (in, out).
    w_pt = _orthogonal(k1, PATTERN_NUM, IN_DIM)              # (32, 28)
    bound = 1.0 / jnp.sqrt(IN_DIM)
    b1 = jax.random.uniform(k2, (1, PATTERN_NUM), jnp.float32, -bound, bound)
    patterns = _orthogonal(k3, PATTERN_NUM, PATTERN_LENGTH)  # (32, 24)
    return {
        "w1": w_pt.T,                                        # (28, 32)
        "b1": b1,
        "ln1_g": jnp.ones((1, PATTERN_NUM), jnp.float32),
        "ln1_b": jnp.zeros((1, PATTERN_NUM), jnp.float32),
        "patterns": patterns,
        "ln2_g": jnp.ones((1, PATTERN_LENGTH), jnp.float32),
        "ln2_b": jnp.zeros((1, PATTERN_LENGTH), jnp.float32),
    }


def reference(x, params):
    """Pure-JAX forward identical to the PyTorch module."""
    h = x @ params["w1"] + params["b1"]
    mu = h.mean(-1, keepdims=True)
    var = ((h - mu) ** 2).mean(-1, keepdims=True)
    h = (h - mu) / jnp.sqrt(var + LN_EPS) * params["ln1_g"] + params["ln1_b"]
    p = jax.nn.softmax(h, axis=1)
    r = p @ params["patterns"]
    mu = r.mean(-1, keepdims=True)
    var = ((r - mu) ** 2).mean(-1, keepdims=True)
    r = (r - mu) / jnp.sqrt(var + LN_EPS) * params["ln2_g"] + params["ln2_b"]
    return 0.5 * r * (1.0 + jax.lax.erf(r / jnp.sqrt(2.0)))


if __name__ == "__main__":
    key = jax.random.PRNGKey(0)
    kx, kx2, kp = jax.random.split(key, 3)
    params = make_params(kp)

    # Small batch (exact tile).
    B = 2
    x = jax.random.normal(kx, (B, IN_DIM), jnp.float32)
    out = jax.block_until_ready(generator_p_hd_sum(x, params))
    ref = reference(x, params)
    assert out.shape == (B, PATTERN_LENGTH), out.shape
    assert jnp.all(jnp.isfinite(out))
    assert jnp.allclose(out, ref, atol=1e-4, rtol=1e-4), float(jnp.max(jnp.abs(out - ref)))

    # Ragged batch (exercises wrapper padding / tail handling).
    B2 = 13
    x2 = jax.random.normal(kx2, (B2, IN_DIM), jnp.float32)
    out2 = jax.block_until_ready(generator_p_hd_sum(x2, params))
    ref2 = reference(x2, params)
    assert out2.shape == (B2, PATTERN_LENGTH), out2.shape
    assert jnp.allclose(out2, ref2, atol=1e-4, rtol=1e-4), float(jnp.max(jnp.abs(out2 - ref2)))

    print("KERNEL_OK")
</pallas_src>

<mosaic_0001>
module attributes {stable_mosaic.version = 11 : i64} {
  func.func @generator_kernel(%arg0: i32, %arg1: memref<8x28xf32, #tpu.memory_space<vmem>>, %arg2: memref<28x32xf32, #tpu.memory_space<vmem>>, %arg3: memref<1x32xf32, #tpu.memory_space<vmem>>, %arg4: memref<1x32xf32, #tpu.memory_space<vmem>>, %arg5: memref<1x32xf32, #tpu.memory_space<vmem>>, %arg6: memref<32x24xf32, #tpu.memory_space<vmem>>, %arg7: memref<1x24xf32, #tpu.memory_space<vmem>>, %arg8: memref<1x24xf32, #tpu.memory_space<vmem>>, %arg9: memref<8x24xf32, #tpu.memory_space<vmem>>) attributes {dimension_semantics = [#tpu.dimension_semantics<parallel>], iteration_bounds = array<i64: 1>, scalar_prefetch = 0 : i64, scratch_operands = 0 : i64, tpu.core_type = #tpu.core_type<tc>, window_params = [{transform_indices = @transform_0, window_bounds = array<i64: 8, 28>}, {pipeline_mode = #tpu.pipeline_mode<synchronous>, transform_indices = @transform_1, window_bounds = array<i64: 28, 32>}, {pipeline_mode = #tpu.pipeline_mode<synchronous>, transform_indices = @transform_2, window_bounds = array<i64: 1, 32>}, {pipeline_mode = #tpu.pipeline_mode<synchronous>, transform_indices = @transform_3, window_bounds = array<i64: 1, 32>}, {pipeline_mode = #tpu.pipeline_mode<synchronous>, transform_indices = @transform_4, window_bounds = array<i64: 1, 32>}, {pipeline_mode = #tpu.pipeline_mode<synchronous>, transform_indices = @transform_5, window_bounds = array<i64: 32, 24>}, {pipeline_mode = #tpu.pipeline_mode<synchronous>, transform_indices = @transform_6, window_bounds = array<i64: 1, 24>}, {pipeline_mode = #tpu.pipeline_mode<synchronous>, transform_indices = @transform_7, window_bounds = array<i64: 1, 24>}, {transform_indices = @transform_8, window_bounds = array<i64: 8, 24>}]} {
    %c0 = arith.constant 0 : index
    %c0_0 = arith.constant 0 : index
    %0 = vector.load %arg1[%c0, %c0_0] : memref<8x28xf32, #tpu.memory_space<vmem>>, vector<8x28xf32>
    %c0_1 = arith.constant 0 : index
    %c0_2 = arith.constant 0 : index
    %1 = vector.load %arg2[%c0_1, %c0_2] : memref<28x32xf32, #tpu.memory_space<vmem>>, vector<28x32xf32>
    %cst = arith.constant dense<0.000000e+00> : vector<8x32xf32>
    %2 = tpu.matmul %0, %1, %cst {dimension_numbers = #tpu.dot_dimension_numbers<[1], [0], [0], [1], [0, 0, 1, 1], [], []>} : vector<8x28xf32>, vector<28x32xf32>, vector<8x32xf32> -> vector<8x32xf32>
    %c0_3 = arith.constant 0 : index
    %c0_4 = arith.constant 0 : index
    %3 = vector.load %arg3[%c0_3, %c0_4] : memref<1x32xf32, #tpu.memory_space<vmem>>, vector<1x32xf32>
    %4 = vector.broadcast %3 : vector<1x32xf32> to vector<8x32xf32>
    %5 = arith.addf %2, %4 : vector<8x32xf32>
    %c0_5 = arith.constant 0 : index
    %c0_6 = arith.constant 0 : index
    %6 = vector.load %arg4[%c0_5, %c0_6] : memref<1x32xf32, #tpu.memory_space<vmem>>, vector<1x32xf32>
    %c0_7 = arith.constant 0 : index
    %c0_8 = arith.constant 0 : index
    %7 = vector.load %arg5[%c0_7, %c0_8] : memref<1x32xf32, #tpu.memory_space<vmem>>, vector<1x32xf32>
    %cst_9 = arith.constant dense<0.000000e+00> : vector<8xf32>
    %8 = vector.multi_reduction <add>, %5, %cst_9 [1] : vector<8x32xf32> to vector<8xf32>
    %9 = vector.shape_cast %8 : vector<8xf32> to vector<8x1xf32>
    %cst_10 = arith.constant 3.200000e+01 : f32
    %10 = vector.broadcast %cst_10 : f32 to vector<8x1xf32>
    %11 = arith.divf %9, %10 : vector<8x1xf32>
    %12 = arith.mulf %5, %5 : vector<8x32xf32>
    %cst_11 = arith.constant dense<0.000000e+00> : vector<8xf32>
    %13 = vector.multi_reduction <add>, %12, %cst_11 [1] : vector<8x32xf32> to vector<8xf32>
    %14 = vector.shape_cast %13 : vector<8xf32> to vector<8x1xf32>
    %cst_12 = arith.constant 3.200000e+01 : f32
    %15 = vector.broadcast %cst_12 : f32 to vector<8x1xf32>
    %16 = arith.divf %14, %15 : vector<8x1xf32>
    %17 = arith.mulf %11, %11 : vector<8x1xf32>
    %18 = arith.subf %16, %17 : vector<8x1xf32>
    %cst_13 = arith.constant 0.000000e+00 : f32
    %19 = vector.broadcast %cst_13 : f32 to vector<8x1xf32>
    %20 = arith.maximumf %18, %19 : vector<8x1xf32>
    %21 = vector.broadcast %11 : vector<8x1xf32> to vector<8x32xf32>
    %22 = arith.subf %5, %21 : vector<8x32xf32>
    %cst_14 = arith.constant 9.99999974E-6 : f32
    %23 = vector.broadcast %cst_14 : f32 to vector<8x1xf32>
    %24 = arith.addf %20, %23 : vector<8x1xf32>
    %25 = math.rsqrt %24 : vector<8x1xf32>
    %26 = vector.broadcast %25 : vector<8x1xf32> to vector<8x32xf32>
    %27 = arith.mulf %22, %26 : vector<8x32xf32>
    %28 = vector.broadcast %6 : vector<1x32xf32> to vector<8x32xf32>
    %29 = arith.mulf %27, %28 : vector<8x32xf32>
    %30 = vector.broadcast %7 : vector<1x32xf32> to vector<8x32xf32>
    %31 = arith.addf %29, %30 : vector<8x32xf32>
    %cst_15 = arith.constant dense<0xFF800000> : vector<8xf32>
    %32 = vector.multi_reduction <maximumf>, %31, %cst_15 [1] : vector<8x32xf32> to vector<8xf32>
    %33 = vector.shape_cast %32 : vector<8xf32> to vector<8x1xf32>
    %34 = vector.broadcast %33 : vector<8x1xf32> to vector<8x32xf32>
    %35 = arith.subf %31, %34 : vector<8x32xf32>
    %36 = math.exp %35 : vector<8x32xf32>
    %cst_16 = arith.constant dense<0.000000e+00> : vector<8xf32>
    %37 = vector.multi_reduction <add>, %36, %cst_16 [1] : vector<8x32xf32> to vector<8xf32>
    %38 = vector.shape_cast %37 : vector<8xf32> to vector<8x1xf32>
    %39 = tpu.reciprocal %38 {approx = true} : vector<8x1xf32> -> vector<8x1xf32>
    %40 = vector.broadcast %39 : vector<8x1xf32> to vector<8x32xf32>
    %41 = arith.mulf %36, %40 : vector<8x32xf32>
    %c0_17 = arith.constant 0 : index
    %c0_18 = arith.constant 0 : index
    %42 = vector.load %arg6[%c0_17, %c0_18] : memref<32x24xf32, #tpu.memory_space<vmem>>, vector<32x24xf32>
    %cst_19 = arith.constant dense<0.000000e+00> : vector<8x24xf32>
    %43 = tpu.matmul %41, %42, %cst_19 {dimension_numbers = #tpu.dot_dimension_numbers<[1], [0], [0], [1], [0, 0, 1, 1], [], []>} : vector<8x32xf32>, vector<32x24xf32>, vector<8x24xf32> -> vector<8x24xf32>
    %c0_20 = arith.constant 0 : index
    %c0_21 = arith.constant 0 : index
    %44 = vector.load %arg7[%c0_20, %c0_21] : memref<1x24xf32, #tpu.memory_space<vmem>>, vector<1x24xf32>
    %c0_22 = arith.constant 0 : index
    %c0_23 = arith.constant 0 : index
    %45 = vector.load %arg8[%c0_22, %c0_23] : memref<1x24xf32, #tpu.memory_space<vmem>>, vector<1x24xf32>
    %cst_24 = arith.constant dense<0.000000e+00> : vector<8xf32>
    %46 = vector.multi_reduction <add>, %43, %cst_24 [1] : vector<8x24xf32> to vector<8xf32>
    %47 = vector.shape_cast %46 : vector<8xf32> to vector<8x1xf32>
    %cst_25 = arith.constant 2.400000e+01 : f32
    %48 = vector.broadcast %cst_25 : f32 to vector<8x1xf32>
    %49 = arith.divf %47, %48 : vector<8x1xf32>
    %50 = arith.mulf %43, %43 : vector<8x24xf32>
    %cst_26 = arith.constant dense<0.000000e+00> : vector<8xf32>
    %51 = vector.multi_reduction <add>, %50, %cst_26 [1] : vector<8x24xf32> to vector<8xf32>
    %52 = vector.shape_cast %51 : vector<8xf32> to vector<8x1xf32>
    %cst_27 = arith.constant 2.400000e+01 : f32
    %53 = vector.broadcast %cst_27 : f32 to vector<8x1xf32>
    %54 = arith.divf %52, %53 : vector<8x1xf32>
    %55 = arith.mulf %49, %49 : vector<8x1xf32>
    %56 = arith.subf %54, %55 : vector<8x1xf32>
    %cst_28 = arith.constant 0.000000e+00 : f32
    %57 = vector.broadcast %cst_28 : f32 to vector<8x1xf32>
    %58 = arith.maximumf %56, %57 : vector<8x1xf32>
    %59 = vector.broadcast %49 : vector<8x1xf32> to vector<8x24xf32>
    %60 = arith.subf %43, %59 : vector<8x24xf32>
    %cst_29 = arith.constant 9.99999974E-6 : f32
    %61 = vector.broadcast %cst_29 : f32 to vector<8x1xf32>
    %62 = arith.addf %58, %61 : vector<8x1xf32>
    %63 = math.rsqrt %62 : vector<8x1xf32>
    %64 = vector.broadcast %63 : vector<8x1xf32> to vector<8x24xf32>
    %65 = arith.mulf %60, %64 : vector<8x24xf32>
    %66 = vector.broadcast %44 : vector<1x24xf32> to vector<8x24xf32>
    %67 = arith.mulf %65, %66 : vector<8x24xf32>
    %68 = vector.broadcast %45 : vector<1x24xf32> to vector<8x24xf32>
    %69 = arith.addf %67, %68 : vector<8x24xf32>
    %cst_30 = arith.constant 5.000000e-01 : f32
    %70 = vector.broadcast %cst_30 : f32 to vector<8x24xf32>
    %71 = arith.mulf %70, %69 : vector<8x24xf32>
    %cst_31 = arith.constant 2.000000e+00 : f32
    %72 = math.sqrt %cst_31 : f32
    %cst_32 = arith.constant 1.000000e+00 : f32
    %73 = arith.divf %cst_32, %72 : f32
    %74 = vector.broadcast %73 : f32 to vector<8x24xf32>
    %75 = arith.mulf %69, %74 : vector<8x24xf32>
    %76 = math.erf %75 : vector<8x24xf32>
    %cst_33 = arith.constant 1.000000e+00 : f32
    %77 = vector.broadcast %cst_33 : f32 to vector<8x24xf32>
    %78 = arith.addf %77, %76 : vector<8x24xf32>
    %79 = arith.mulf %71, %78 : vector<8x24xf32>
    %c0_34 = arith.constant 0 : index
    %c0_35 = arith.constant 0 : index
    %80 = vector.load %arg9[%c0_34, %c0_35] : memref<8x24xf32, #tpu.memory_space<vmem>>, vector<8x24xf32>
    tpu.vector_store %arg9[%c0_34, %c0_35], %79 {strides = array<i32>} : memref<8x24xf32, #tpu.memory_space<vmem>>, vector<8x24xf32>,
    return
  }
  func.func @transform_0(%arg0: i32) -> (i32, i32) {
    %c0_i32 = arith.constant 0 : i32
    %c0_i32_0 = arith.constant 0 : i32
    return %arg0, %c0_i32 : i32, i32
  }
  func.func @transform_1(%arg0: i32) -> (i32, i32) {
    %c0_i32 = arith.constant 0 : i32
    %c0_i32_0 = arith.constant 0 : i32
    %c0_i32_1 = arith.constant 0 : i32
    return %c0_i32, %c0_i32_0 : i32, i32
  }
  func.func @transform_2(%arg0: i32) -> (i32, i32) {
    %c0_i32 = arith.constant 0 : i32
    %c0_i32_0 = arith.constant 0 : i32
    %c0_i32_1 = arith.constant 0 : i32
    return %c0_i32, %c0_i32_0 : i32, i32
  }
  func.func @transform_3(%arg0: i32) -> (i32, i32) {
    %c0_i32 = arith.constant 0 : i32
    %c0_i32_0 = arith.constant 0 : i32
    %c0_i32_1 = arith.constant 0 : i32
    return %c0_i32, %c0_i32_0 : i32, i32
  }
  func.func @transform_4(%arg0: i32) -> (i32, i32) {
    %c0_i32 = arith.constant 0 : i32
    %c0_i32_0 = arith.constant 0 : i32
    %c0_i32_1 = arith.constant 0 : i32
    return %c0_i32, %c0_i32_0 : i32, i32
  }
  func.func @transform_5(%arg0: i32) -> (i32, i32) {
    %c0_i32 = arith.constant 0 : i32
    %c0_i32_0 = arith.constant 0 : i32
    %c0_i32_1 = arith.constant 0 : i32
    return %c0_i32, %c0_i32_0 : i32, i32
  }
  func.func @transform_6(%arg0: i32) -> (i32, i32) {
    %c0_i32 = arith.constant 0 : i32
    %c0_i32_0 = arith.constant 0 : i32
    %c0_i32_1 = arith.constant 0 : i32
    return %c0_i32, %c0_i32_0 : i32, i32
  }
  func.func @transform_7(%arg0: i32) -> (i32, i32) {
    %c0_i32 = arith.constant 0 : i32
    %c0_i32_0 = arith.constant 0 : i32
    %c0_i32_1 = arith.constant 0 : i32
    return %c0_i32, %c0_i32_0 : i32, i32
  }
  func.func @transform_8(%arg0: i32) -> (i32, i32) {
    %c0_i32 = arith.constant 0 : i32
    %c0_i32_0 = arith.constant 0 : i32
    return %arg0, %c0_i32 : i32, i32
  }
}

</mosaic_0001>

<bundles_post_ra>
// kernel: tpu_custom_call.1
= control target key start
LH: loop header
LB: loop body
LE: loop exit
PB: predicated region body
PF: predicated region fallthrough
CT: control target
= control target key end

     0   :  { %vm46_vm0 = vcmask 1043456   ;;  %v388_v3 = vmov 0.0|0.0   ;;  %vm389_vm1 = vmmov 0   ;;  %v390_v6 = vmov 0.0   ;;  %s501_s0 = inlined_call_operand.vmem [shape: f32[8,28], index: 0, kind: input, shape index: {}]   ;;  %s502_s1 = inlined_call_operand.vmem [shape: f32[28,32], index: 1, kind: input, shape index: {}]   ;;  %s503_s2 = inlined_call_operand.vmem [shape: f32[1,32], index: 2, kind: input, shape index: {}]   ;;  %s504_s3 = inlined_call_operand.vmem [shape: f32[1,32], index: 3, kind: input, shape index: {}]   ;;  %s505_s4 = inlined_call_operand.vmem [shape: f32[1,32], index: 4, kind: input, shape index: {}]   ;;  %s506_s5 = inlined_call_operand.vmem [shape: f32[32,24], index: 5, kind: input, shape index: {}]   ;;  %s507_s6 = inlined_call_operand.vmem [shape: f32[1,24], index: 6, kind: input, shape index: {}]   ;;  %s508_s7 = inlined_call_operand.vmem [shape: f32[1,24], index: 7, kind: input, shape index: {}]   ;;  %s509_s8 = inlined_call_operand.hbm [shape: f32[8,24], index: 8, kind: output, shape index: {}]  }
   0x1   :  { %v31_v0 = vld [vmem:[%s502_s1] sm:$0xff]  ;;  %v32_v1 = vld [vmem:[%s502_s1 + $0x8] sm:$0xff]  ;;  %v33_v2 = vld [vmem:[%s502_s1 + $0x10] sm:$0xff]  ;;  %336 = vmatprep.subr.bf16.mxu0 %v388_v3  ;;  %343 = vmatprep.subr.bf16.mxu1 %v388_v3 }
   0x2   :  { %v337_v4 = vpack.c.bf16 %v32_v1, %v31_v0  ;;  %v34_v5 = vld [vmem:[%s502_s1 + $0x18] sm:$0xf]  ;;  %322 = vmatprep.mubr.msk.f32.mxu0 %vm389_vm1, %v390_v6  ;;  %333 = vmatprep.mubr.msk.f32.mxu1 %vm389_vm1, %v390_v6 }
   0x3   :  { %13 = vsyncpa [#allocation3], 0  ;;  %v340_v7 = vpack.c.bf16 %v34_v5, %v33_v2  ;;  %vm391_vm2 = vmmov 1   ;;  %v30_v8 = vld [vmem:[%s501_s0] sm:$0xff]  ;;  %vm42_vm4 = vcmask 228352   ;;  %vm122_vm5 = vcmask 261120  }
   0x4   :  { %338 = vmatpush3.bf16.msra.mxu0 %v337_v4  ;;  %vm341_vm3 = vmpackc.low %vm46_vm0, %vm391_vm2  ;;  %v296_v9 = vld [vmem:[%s503_s2] ss:$0 sm:$0xff]  ;;  %v166_v38 = vld [vmem:[%s506_s5 + $0x8] sm:$0xff]  ;;  %vm244_vm6 = vcmask 195584   ;;  %s392_s27 = smov [#allocation2]  }
   0x5   :  { %339 = vmatprep.subr.bf16.mxu0 %v388_v3  ;;  %v299_v26 = vld [vmem:[%s504_s3] ss:$0 sm:$0xff]  ;;  %v167_v39 = vld [vmem:[%s506_s5 + $0x10] sm:$0xff]  ;;  %v168_v41 = vld [vmem:[%s506_s5 + $0x18] sm:$0xff]  ;;  %s288_s28 = sshll.u32 %s392_s27, 4  ;;  %s289_s28 = int_to_ptr.vmem [resolvable:$true] %s288_s28 }
   0x6   :  { %v300_v28 = vld [vmem:[%s505_s4] ss:$0 sm:$0xff]  ;;  %v347_v42 = vpack.c.bf16 %v168_v41, %v167_v39  ;;  %s364_s29 = scalar_lea.vmem %s289_s28, 128  ;;  %p369_p1 = scmp.lt.s32.totalorder %s289_s28, %s289_s28 }
   0x7   :  { %v165_v37 = vld [vmem:[%s506_s5] sm:$0xff]  ;;  %p365_p0 = scmp.ne.s32.totalorder %s289_s28, %s364_s29  ;;  %p370_p2 = scmp.lt.s32.totalorder %s364_s29, %s364_s29 }
   0x8   :  { %342 = vmatpush3.bf16.msk.msra.mxu0 %vm341_vm3, %v340_v7  ;;  %v344_v40 = vpack.c.bf16 %v166_v38, %v165_v37  ;;  %v302_v61 = vld [vmem:[%s507_s6] ss:$0 sm:$0xff] }
   0x9   :  { %v303_v63 = vld [vmem:[%s508_s7] ss:$0 sm:$0xff]  ;;  %p371_p3 = por %p370_p2, %p369_p1 }
   0xa   :  { %345 = vmatpush3.bf16.msra.mxu1 %v344_v40 }
   0xb   :  { %323 = vmatmul.mubr.msk.f32.vlgmr.msra.gmra.mrb[0].mxu0 %vm42_vm4, %v30_v8  ;;  %346 = vmatprep.subr.bf16.mxu1 %v388_v3  ;;  %p372_p4 = pnand %p371_p3, %p365_p0 }
   0xe   :  { %348 = vmatpush3.bf16.msra.mxu1 %v347_v42 }
  0xde   :  { %v116_v10 = vpop.f32.mrb[0].mxu0 }
  0xdf   :  { %v117_v11 = vadd.f32 %v296_v9, %v116_v10  ;;  %v324_v12 = vpop.f32.mrb[1].mxu0 }
  0xe1   :  { %v123_v13 = vsel %vm122_vm5, %v117_v11, 0.0  ;;  %v128_v14 = vmul.f32 %v117_v11, %v117_v11 }
  0xe2   :  { %124 = vadd.xlane.f32.xlu0 %v123_v13 }
  0xe3   :  { %v129_v15 = vsel %vm122_vm5, %v128_v14, 0.0 }
  0xe6   :  { %130 = vadd.xlane.f32.xlu0 %v129_v15 }
 0x16f   :  { %v125_v16 = vpop.xlane.xlu0 %124 }
 0x170   :  { %v127_v17 = vmul.f32 0.03125, %v125_v16 }
 0x172   :  { %v133_v19 = vmul.f32 %v127_v17, %v127_v17  ;;  %v136_v24 = vsub.f32 %v117_v11, %v127_v17 }
 0x173   :  { %v131_v18 = vpop.xlane.xlu0 %130 }
 0x174   :  { %v132_v20 = vmul.f32 0.03125, %v131_v18 }
 0x176   :  { %v134_v21 = vsub.f32 %v132_v20, %v133_v19 }
 0x178   :  { %v135_v22 = vmax.f32 %v134_v21, 0.0 }
 0x17a   :  { %v137_v23 = vadd.f32 1e-05, %v135_v22 }
 0x17c   :  { %354 = vrsqrt.f32 %v137_v23 }
 0x186   :  { %v355_v25 = vpop.eup %354 }
 0x187   :  { %v139_v27 = vmul.f32 %v355_v25, %v136_v24 }
 0x189   :  { %v146_v29 = vmul.f32 %v299_v26, %v139_v27 }
 0x18b   :  { %v153_v30 = vadd.f32 %v300_v28, %v146_v29 }
 0x18d   :  { %v154_v31 = vsel %vm122_vm5, %v153_v30, -inf }
 0x18e   :  { %155 = vmax.xlane.f32.xlu1 %v154_v31 }
 0x21b   :  { %v156_v32 = vpop.xlane.xlu1 %155 }
 0x21c   :  { %v157_v33 = vsub.f32 %v153_v30, %v156_v32 }
 0x21e   :  { %v158_v34 = vmul.f32 1.442695, %v157_v33 }
 0x220   :  { %356 = vpow2.f32 %v158_v34 }
 0x22a   :  { %v357_v35 = vpop.eup %356 }
 0x22b   :  { %v160_v36 = vsel %vm122_vm5, %v357_v35, 0.0 }
 0x22c   :  { %161 = vadd.xlane.f32.xlu1 %v160_v36 }
 0x2b9   :  { %v162_v43 = vpop.xlane.xlu1 %161 }
 0x2ba   :  { %358 = vrcp.f32 %v162_v43 }
 0x2c4   :  { %v359_v44 = vpop.eup %358 }
 0x2c5   :  { %v164_v45 = vmul.f32 %v359_v44, %v357_v35 }
 0x2c7   :  { %334 = vmatmul.mubr.msk.f32.vlgmr.msra.gmra.mrb[0].mxu1 %vm122_vm5, %v164_v45 }
 0x39a   :  { %v238_v46 = vpop.f32.mrb[0].mxu1 }
 0x39b   :  { %v335_v47 = vpop.f32.mrb[1].mxu1  ;;  %v245_v48 = vsel %vm244_vm6, %v238_v46, 0.0  ;;  %v250_v49 = vmul.f32 %v238_v46, %v238_v46 }
 0x39c   :  { %246 = vadd.xlane.f32.xlu0 %v245_v48 }
 0x39d   :  { %v251_v50 = vsel %vm244_vm6, %v250_v49, 0.0 }
 0x39e   :  { %252 = vadd.xlane.f32.xlu1 %v251_v50 }
 0x429   :  { %v247_v51 = vpop.xlane.xlu0 %246 }
 0x42a   :  { %v249_v52 = vmul.f32 0.041666668, %v247_v51 }
 0x42b   :  { %v253_v53 = vpop.xlane.xlu1 %252 }
 0x42c   :  { %v255_v54 = vmul.f32 %v249_v52, %v249_v52  ;;  %v254_v55 = vmul.f32 0.041666668, %v253_v53  ;;  %v258_v59 = vsub.f32 %v238_v46, %v249_v52 }
 0x42e   :  { %v256_v56 = vsub.f32 %v254_v55, %v255_v54 }
 0x430   :  { %v257_v57 = vmax.f32 %v256_v56, 0.0 }
 0x432   :  { %v259_v58 = vadd.f32 1e-05, %v257_v57 }
 0x434   :  { %360 = vrsqrt.f32 %v259_v58 }
 0x43e   :  { %v361_v60 = vpop.eup %360 }
 0x43f   :  { %v261_v62 = vmul.f32 %v361_v60, %v258_v59 }
 0x441   :  { %v268_v0 = vmul.f32 %v302_v61, %v261_v62 }
 0x443   :  { %v275_v1 = vadd.f32 %v303_v63, %v268_v0 }
 0x445   :  { %v277_v2 = vmul.f32 0.70710677, %v275_v1  ;;  %v276_v4 = vmul.f32 0.5, %v275_v1 }
 0x447   :  { %362 = verf.f32 %v277_v2 }
 0x451   :  { %v363_v3 = vpop.eup %362 }
 0x452   :  { %v279_v5 = vadd.f32 1.0, %v363_v3 }
 0x454   :  { %v280_v6 = vmul.f32 %v279_v5, %v276_v4 }
 0x456   :  { %281 = vst.msk [vmem:[#allocation2] sm:$0xff] %vm244_vm6, %v280_v6 }
 0x457   :  { %375 = shalt.err (!%p372_p4)
}
 0x458   :  { %s376_s30 = scalar_lea.hbm %s509_s8, 128 }
 0x459   :  { %p377_p5 = scmp.ne.s32.totalorder %s509_s8, %s376_s30  ;;  %p380_p6 = scmp.lt.u32.totalorder %s376_s30, %s509_s8 }
 0x45b   :  { %p382_p7 = pnand %p380_p6, %p377_p5 }
 0x45d   :  { %385 = shalt.err (!%p382_p7)
}
 0x45e   :  { %291 = dma.vmem_to_hbm [thread:$0]  %s289_s28, 128, %s509_s8, [#allocation3]  }
 0x45f   :  { %386 = dma.done.wait [#allocation3], 128  }
 0x460   :  { %387 = vsyncadd [#allocation3], 4294967168 }
 0x461   :  { %295 = vsyncpa [#allocation3], 1 }

</bundles_post_ra>
